<compile_context>
chip_gen: v7x
topology: tpu7x:2x2x1
jax: 0.10.0
libtpu: 0.0.40
codegen_flags: <defaults>
</compile_context>

<pallas_src>
import jax
import jax.numpy as jnp
from jax.experimental import pallas as pl
from jax.experimental.pallas import tpu as pltpu


_LANE = 128                     # vreg lane width; batch tile is a multiple of it
_MAX_TILE = 131072              # lanes per grid step; (8,tb)+(8,tb) f32 double-
                                # buffered ~= 16 MiB VMEM -> safe on v5e/v6e/v7x
_VMEM_LIMIT_BYTES = 32 * 1024 * 1024   # explicit scoped-VMEM limit (v5e default is 16 MiB)
_PALLAS_MIN_BATCH = 65536       # below this, fused XLA beats kernel dispatch + transpose


def _round_up(n: int, m: int) -> int:
    return ((n + m - 1) // m) * m


def _linear3_kernel(w_ref, b_ref, xT_ref, o_ref):
    # w_ref: (3,) f32 SMEM, b_ref: (1,) f32 SMEM (scalar broadcasts, VPU only).
    # xT_ref: (3, TB) f32 VMEM block (features on sublanes, batch on lanes).
    # o_ref:  (1, TB) f32 VMEM block (lane-dense output slab, unmasked vst).
    x = xT_ref[...]
    y = (x[0:1, :] * w_ref[0]
         + x[1:2, :] * w_ref[1]
         + x[2:3, :] * w_ref[2]
         + b_ref[0])
    o_ref[...] = y.astype(o_ref.dtype)


def linear3_pallas_features_major(xT, weight, bias):
    """Pallas path for nn.Linear(3, 1).

    xT:     (3, B) float32  (features-major / lane-dense batch; no transpose needed)
    weight: (1, 3) float32  (PyTorch layout)
    bias:   (1,)   float32
    returns (B,)   float32
    """
    F, B = xT.shape
    assert F == 3, "VolumePredictor expects 3 input features"

    # Batch tile: multiple of 128 lanes, large enough that DMA time dominates
    # the fixed per-grid-step overhead.  VMEM/step ~= 64*tb bytes (x2 buffered).
    tb = min(_round_up(B, _LANE), _MAX_TILE)
    num_tiles = pl.cdiv(B, tb)

    w = weight.reshape(F).astype(jnp.float32)   # (3,) scalars for SMEM
    b = bias.reshape(1).astype(jnp.float32)     # (1,) scalar for SMEM

    out = pl.pallas_call(
        _linear3_kernel,
        out_shape=jax.ShapeDtypeStruct((1, B), xT.dtype),
        grid_spec=pltpu.PrefetchScalarGridSpec(
            num_scalar_prefetch=0,
            grid=(num_tiles,),
            in_specs=[
                pl.BlockSpec(memory_space=pltpu.MemorySpace.SMEM),  # weight (3,)
                pl.BlockSpec(memory_space=pltpu.MemorySpace.SMEM),  # bias   (1,)
                pl.BlockSpec((F, tb), lambda i: (0, i)),            # xT tile
            ],
            # Keep the output lane-dense (1, tb): a (tb, 1) tile would flip the
            # kernel into masked-vst-bound (measured ~4.5x penalty).
            out_specs=pl.BlockSpec((1, tb), lambda i: (0, i)),
        ),
        compiler_params=pltpu.CompilerParams(
            # Independent batch tiles; on v7x this lets the grid axis shard
            # across both TensorCores' DMA queues.
            dimension_semantics=("parallel",),
            vmem_limit_bytes=_VMEM_LIMIT_BYTES,
        ),
    )(w, b, xT)

    # (1, B) -> (B,) is a free metadata reshape (no copy).
    return out.reshape(B)


def volume_predictor_forward(x, weight, bias, *, force_pallas: bool = False):
    """Forward pass of VolumePredictor (nn.Linear(3, 1)).

    x:      (B, 3) float32
    weight: (1, 3) float32
    bias:   (1,)   float32
    returns (B, 1) float32
    """
    B, F = x.shape
    assert F == 3, "VolumePredictor expects 3 input features"

    if not force_pallas and B < _PALLAS_MIN_BATCH:
        # Small batch: a single fused XLA pass (read 12 B/row, write 4 B/row)
        # beats kernel dispatch + layout ops.
        return (x @ weight.T + bias).astype(x.dtype)

    # TODO(synk): for peak throughput the producer should emit features-major
    # (3, B) activations and call linear3_pallas_features_major directly; with
    # a PyTorch-shaped (B, 3) input this one transpose pass is unavoidable.
    xT = x.T
    y = linear3_pallas_features_major(xT, weight, bias)
    return y.reshape(B, 1)   # free reshape, no padded-array slice


if __name__ == "__main__":
    key = jax.random.PRNGKey(0)
    kx, kw, kb = jax.random.split(key, 3)

    # Deterministic synthetic parameters matching nn.Linear(3, 1) shapes.
    weight = jax.random.normal(kw, (1, 3), dtype=jnp.float32) * 0.5
    bias = jax.random.normal(kb, (1,), dtype=jnp.float32) * 0.1

    # Small batch of feature vectors (batch=8, features=3): force the Pallas path.
    x = jax.random.normal(kx, (8, 3), dtype=jnp.float32)
    y = volume_predictor_forward(x, weight, bias, force_pallas=True)
    jax.block_until_ready(y)
    y_ref = x @ weight.T + bias
    assert y.shape == (8, 1)
    assert jnp.allclose(y, y_ref, atol=1e-5, rtol=1e-5)

    # Non-lane-aligned batch: exercises the ragged last tile (edge masking, no pad).
    x2 = jax.random.normal(jax.random.PRNGKey(1), (300, 3), dtype=jnp.float32)
    y2 = volume_predictor_forward(x2, weight, bias, force_pallas=True)
    jax.block_until_ready(y2)
    y2_ref = x2 @ weight.T + bias
    assert y2.shape == (300, 1)
    assert jnp.allclose(y2, y2_ref, atol=1e-5, rtol=1e-5)

    # Default dispatch branch (small batch -> fused XLA expression).
    y3 = volume_predictor_forward(x, weight, bias)
    jax.block_until_ready(y3)
    assert y3.shape == (8, 1)
    assert jnp.allclose(y3, y_ref, atol=1e-5, rtol=1e-5)

    print("KERNEL_OK")
</pallas_src>

<mosaic_0001>
module attributes {stable_mosaic.version = 11 : i64} {
  func.func @_linear3_kernel(%arg0: i32, %arg1: memref<3xf32, #tpu.memory_space<smem>>, %arg2: memref<1xf32, #tpu.memory_space<smem>>, %arg3: memref<3x128xf32, #tpu.memory_space<vmem>>, %arg4: memref<1x128xf32, #tpu.memory_space<vmem>>) attributes {dimension_semantics = [#tpu.dimension_semantics<parallel>], iteration_bounds = array<i64: 1>, scalar_prefetch = 0 : i64, scratch_operands = 0 : i64, tpu.core_type = #tpu.core_type<tc>, window_params = [{transform_indices = @transform_0, window_bounds = array<i64: 3>}, {transform_indices = @transform_1, window_bounds = array<i64: 1>}, {transform_indices = @transform_2, window_bounds = array<i64: 3, 128>}, {transform_indices = @transform_3, window_bounds = array<i64: 1, 128>}]} {
    %c0 = arith.constant 0 : index
    %c0_0 = arith.constant 0 : index
    %0 = vector.load %arg3[%c0, %c0_0] : memref<3x128xf32, #tpu.memory_space<vmem>>, vector<3x128xf32>
    %1 = vector.extract_strided_slice %0 {offsets = [0, 0], sizes = [1, 128], strides = [1, 1]} : vector<3x128xf32> to vector<1x128xf32>
    %c0_1 = arith.constant 0 : index
    %2 = memref.load %arg1[%c0_1] : memref<3xf32, #tpu.memory_space<smem>>
    %3 = vector.broadcast %2 : f32 to vector<1x128xf32>
    %4 = arith.mulf %1, %3 : vector<1x128xf32>
    %5 = vector.extract_strided_slice %0 {offsets = [1, 0], sizes = [1, 128], strides = [1, 1]} : vector<3x128xf32> to vector<1x128xf32>
    %c1 = arith.constant 1 : index
    %6 = memref.load %arg1[%c1] : memref<3xf32, #tpu.memory_space<smem>>
    %7 = vector.broadcast %6 : f32 to vector<1x128xf32>
    %8 = arith.mulf %5, %7 : vector<1x128xf32>
    %9 = arith.addf %4, %8 : vector<1x128xf32>
    %10 = vector.extract_strided_slice %0 {offsets = [2, 0], sizes = [1, 128], strides = [1, 1]} : vector<3x128xf32> to vector<1x128xf32>
    %c2 = arith.constant 2 : index
    %11 = memref.load %arg1[%c2] : memref<3xf32, #tpu.memory_space<smem>>
    %12 = vector.broadcast %11 : f32 to vector<1x128xf32>
    %13 = arith.mulf %10, %12 : vector<1x128xf32>
    %14 = arith.addf %9, %13 : vector<1x128xf32>
    %c0_2 = arith.constant 0 : index
    %15 = memref.load %arg2[%c0_2] : memref<1xf32, #tpu.memory_space<smem>>
    %16 = vector.broadcast %15 : f32 to vector<1x128xf32>
    %17 = arith.addf %14, %16 : vector<1x128xf32>
    %c0_3 = arith.constant 0 : index
    %c0_4 = arith.constant 0 : index
    %18 = vector.load %arg4[%c0_3, %c0_4] : memref<1x128xf32, #tpu.memory_space<vmem>>, vector<1x128xf32>
    tpu.vector_store %arg4[%c0_3, %c0_4], %17 {strides = array<i32>} : memref<1x128xf32, #tpu.memory_space<vmem>>, vector<1x128xf32>,
    return
  }
  func.func @transform_0(%arg0: i32) -> i32 {
    %c0_i32 = arith.constant 0 : i32
    %c0_i32_0 = arith.constant 0 : i32
    return %c0_i32 : i32
  }
  func.func @transform_1(%arg0: i32) -> i32 {
    %c0_i32 = arith.constant 0 : i32
    %c0_i32_0 = arith.constant 0 : i32
    return %c0_i32 : i32
  }
  func.func @transform_2(%arg0: i32) -> (i32, i32) {
    %c0_i32 = arith.constant 0 : i32
    %c0_i32_0 = arith.constant 0 : i32
    return %c0_i32, %arg0 : i32, i32
  }
  func.func @transform_3(%arg0: i32) -> (i32, i32) {
    %c0_i32 = arith.constant 0 : i32
    %c0_i32_0 = arith.constant 0 : i32
    return %c0_i32, %arg0 : i32, i32
  }
}

</mosaic_0001>

<bundles_post_ra>
// kernel: tpu_custom_call.1
= control target key start
LH: loop header
LB: loop body
LE: loop exit
PB: predicated region body
PF: predicated region fallthrough
CT: control target
= control target key end

     0   :  { %9 = vsyncpa [#allocation5], 0  ;;  %s151_s0 = inlined_call_operand.vmem [shape: f32[3], index: 0, kind: input, shape index: {}]   ;;  %s152_s1 = inlined_call_operand.<no memory space> [shape: f32[1], index: 1, kind: input, shape index: {}]   ;;  %s153_s2 = inlined_call_operand.vmem [shape: f32[3,8], index: 2, kind: input, shape index: {}]   ;;  %s154_s3 = inlined_call_operand.hbm [shape: f32[1,8], index: 3, kind: output, shape index: {}]  }
   0x1   :  { %10 = vsyncpa [#allocation4], 0  ;;  %s17_s14 = sshll.u32 %s151_s0, 4  ;;  %s18_s14 = int_to_ptr.vmem [resolvable:$true] %s17_s14 }
   0x2   :  { %s70_s15 = scalar_lea.vmem %s18_s14, 16  ;;  %p75_p1 = scmp.lt.s32.totalorder %s18_s14, %s18_s14 }
   0x3   :  { %p71_p0 = scmp.ne.s32.totalorder %s18_s14, %s70_s15  ;;  %p76_p2 = scmp.lt.s32.totalorder %s70_s15, %s70_s15 }
   0x5   :  { %p77_p3 = por %p76_p2, %p75_p1 }
   0x7   :  { %p78_p4 = pnand %p77_p3, %p71_p0 }
   0x9   :  { %81 = shalt.err (!%p78_p4)
}
   0xa   :  { %s108_s16 = smov [#allocation3]  }
   0xb   :  { %20 = dma.vmem_to_smem %s18_s14, 16, %s108_s16, [#allocation5]  }
   0xc   :  { %104 = dma.done.wait [#allocation5], 16  }
   0xd   :  { %105 = vsyncadd [#allocation5], 4294967280 }
   0xe   :  { %28 = sfence }
   0xf   :  { %s30_s17 = sld [smem:[#allocation3]]  ;;  %s66_s18 = sld [smem:[#allocation3 + $0x1]]  ;;  %v29_v0 = vld [vmem:[%s153_s2] sm:$0x7]  ;;  %v48_v10 = vstv %s152_s1 }
  0x10   :  { %s67_s19 = sld [smem:[#allocation3 + $0x2]]  ;;  %s109_s23 = smov [#allocation6]  }
  0x11   :  { %s57_s24 = sshll.u32 %s109_s23, 4  ;;  %s58_s24 = int_to_ptr.vmem [resolvable:$true] %s57_s24 }
  0x12   :  { %s82_s2 = scalar_lea.vmem %s58_s24, 16  ;;  %s86_s25 = scalar_lea.vmem %s58_s24, 32 }
  0x13   :  { %p83_p5 = scmp.ne.s32.totalorder %s58_s24, %s82_s2  ;;  %p87_p6 = scmp.lt.s32.totalorder %s58_s24, %s58_s24 }
  0x14   :  { %p88_p7 = scmp.lt.s32.totalorder %s86_s25, %s82_s2 }
  0x15   :  { %v31_v1 = vstv %s30_s17  ;;  %v34_v2 = vstv %s66_s18 }
  0x16   :  { %v32_v3 = vmul.f32 %v31_v1, %v29_v0  ;;  %v35_v4 = vmul.f32 %v34_v2, %v29_v0  ;;  %v41_v5 = vstv %s67_s19  ;;  %p89_p8 = por %p88_p7, %p87_p6 }
  0x17   :  { %v42_v6 = vmul.f32 %v41_v5, %v29_v0 }
  0x18   :  { %v37_v7 = vrot.slane %v35_v4, 1  ;;  %p90_p9 = pnand %p89_p8, %p83_p5 }
  0x19   :  { %v44_v8 = vrot.slane %v42_v6, 2 }
  0x1a   :  { %v39_v9 = vadd.f32 %v37_v7, %v32_v3 }
  0x1c   :  { %v46_v11 = vadd.f32 %v44_v8, %v39_v9 }
  0x1e   :  { %v49_v12 = vadd.f32 %v48_v10, %v46_v11 }
  0x20   :  { %50 = vst [vmem:[#allocation6] sm:$0x1] %v49_v12 }
  0x21   :  { %93 = shalt.err (!%p90_p9)
}
  0x22   :  { %s94_s28 = scalar_lea.hbm %s154_s3, 16 }
  0x23   :  { %p95_p10 = scmp.ne.s32.totalorder %s154_s3, %s94_s28  ;;  %p98_p11 = scmp.lt.u32.totalorder %s94_s28, %s154_s3 }
  0x25   :  { %p100_p12 = pnand %p98_p11, %p95_p10 }
  0x27   :  { %103 = shalt.err (!%p100_p12)
}
  0x28   :  { %60 = dma.vmem_to_hbm [thread:$0]  %s58_s24, 16, %s154_s3, [#allocation4]  }
  0x29   :  { %106 = dma.done.wait [#allocation4], 16  }
  0x2a   :  { %107 = vsyncadd [#allocation4], 4294967280 }
  0x2b   :  { %64 = vsyncpa [#allocation4], 1 }
  0x2c   :  { %65 = vsyncpa [#allocation5], 1 }

</bundles_post_ra>
